<compile_context>
chip_gen: v7x
topology: tpu7x:2x2x1
jax: 0.10.0
libtpu: 0.0.40
codegen_flags: <defaults>
</compile_context>

<pallas_src>
import functools

import jax
import jax.numpy as jnp
from jax.experimental import pallas as pl
from jax.experimental.pallas import tpu as pltpu


def _round_up(x, m):
    return (x + m - 1) // m * m


def _conv_bn_relu_kernel(w_ref, p_ref, bias_ref, o_ref, *, relu):
    # w_ref:    (Cout, Kp)      bf16 conv weights, BN scale folded in
    # p_ref:    (Kp,  tile_m)   bf16 im2col patch tile (K on sublanes, M on lanes)
    # bias_ref: (Cout, 1)       f32 fused BN shift
    # o_ref:    (Cout, tile_m)  f32 output tile (lane-dense: tile_m % 128 == 0)
    acc = jnp.dot(w_ref[...], p_ref[...], preferred_element_type=jnp.float32)
    y = acc + bias_ref[...]          # f32 epilogue (keeps v5e VPU on f32 path)
    if relu:
        y = jnp.maximum(y, 0.0)
    o_ref[...] = y.astype(o_ref.dtype)


def basic_conv3d(x, weight, gamma, beta, running_mean, running_var,
                 *, stride=1, padding=0, eps=1e-5, relu=True, bn=True,
                 tile_m=1024):
    """x: [N, C_in, D, H, W] (NCDHW, like PyTorch).  Returns [N, C_out, Do, Ho, Wo]."""
    N, Cin, D, H, W = x.shape
    Cout, Cin_w, KD, KH, KW = weight.shape
    assert Cin == Cin_w

    s = stride
    p = padding
    Do = (D + 2 * p - KD) // s + 1
    Ho = (H + 2 * p - KH) // s + 1
    Wo = (W + 2 * p - KW) // s + 1

    T = KD * KH * KW
    K = Cin * T
    M = N * Do * Ho * Wo

    # ---- glue: im2col in bf16, built directly in [K, M] (transposed) layout ----
    # K ordering is (c major, (kd,kh,kw) minor) to match weight.reshape(Cout, K).
    xb = x.astype(jnp.bfloat16)
    xp = jnp.pad(xb, ((0, 0), (0, 0), (p, p), (p, p), (p, p)))
    pieces = []
    for kd in range(KD):
        for kh in range(KH):
            for kw in range(KW):
                pieces.append(
                    xp[:, :,
                       kd:kd + Do * s:s,
                       kh:kh + Ho * s:s,
                       kw:kw + Wo * s:s])              # [N, Cin, Do, Ho, Wo]
    stk = jnp.stack(pieces, axis=0)                     # [T, N, Cin, Do, Ho, Wo]
    patches_t = stk.transpose(2, 0, 1, 3, 4, 5)         # [Cin, T, N, Do, Ho, Wo]
    patches_t = patches_t.reshape(K, M)                 # [K, M]

    # ---- fold eval-mode BatchNorm into per-channel scale/shift ----
    if bn:
        scale = (gamma / jnp.sqrt(running_var + eps)).astype(jnp.float32)
        shift = (beta - running_mean * scale).astype(jnp.float32)
    else:
        scale = jnp.ones((Cout,), jnp.float32)
        shift = jnp.zeros((Cout,), jnp.float32)

    # Fold BN scale into the weight columns; stream weights in bf16.
    w2d = weight.reshape(Cout, K).astype(jnp.float32) * scale[:, None]   # [Cout, K]
    bias2d = shift.reshape(Cout, 1)                                      # [Cout, 1]

    # ---- pad K (bf16 sublane packing) and M (tile granularity) ----
    Kp = _round_up(K, 16)
    tile_m = min(tile_m, _round_up(M, 128))   # keep tiles lane-dense, no over-padding
    Mp = _round_up(M, tile_m)

    if Kp != K:
        w2d = jnp.pad(w2d, ((0, 0), (0, Kp - K)))
    w2d = w2d.astype(jnp.bfloat16)
    if Kp != K or Mp != M:
        patches_t = jnp.pad(patches_t, ((0, Kp - K), (0, Mp - M)))

    kernel = functools.partial(_conv_bn_relu_kernel, relu=relu)
    out2d = pl.pallas_call(
        kernel,
        out_shape=jax.ShapeDtypeStruct((Cout, Mp), jnp.float32),
        grid_spec=pltpu.PrefetchScalarGridSpec(
            num_scalar_prefetch=0,
            grid=(Mp // tile_m,),
            in_specs=[
                pl.BlockSpec((Cout, Kp), lambda i: (0, 0)),     # weights (resident)
                pl.BlockSpec((Kp, tile_m), lambda i: (0, i)),   # patch tile
                pl.BlockSpec((Cout, 1), lambda i: (0, 0)),      # BN shift
            ],
            out_specs=pl.BlockSpec((Cout, tile_m), lambda i: (0, i)),
        ),
        compiler_params=pltpu.CompilerParams(
            dimension_semantics=("parallel",),
            vmem_limit_bytes=48 * 1024 * 1024),
    )(w2d, patches_t, bias2d)

    out = out2d[:, :M].reshape(Cout, N, Do, Ho, Wo)
    return out.transpose(1, 0, 2, 3, 4)                 # back to NCDHW


def _reference(x, weight, gamma, beta, running_mean, running_var,
               *, stride, padding, eps, relu, bn):
    y = jax.lax.conv_general_dilated(
        x, weight,
        window_strides=(stride,) * 3,
        padding=[(padding, padding)] * 3,
        dimension_numbers=("NCDHW", "OIDHW", "NCDHW"))
    if bn:
        sc = (gamma / jnp.sqrt(running_var + eps)).reshape(1, -1, 1, 1, 1)
        sh = (beta - running_mean * gamma / jnp.sqrt(running_var + eps)).reshape(1, -1, 1, 1, 1)
        y = y * sc + sh
    if relu:
        y = jnp.maximum(y, 0.0)
    return y


if __name__ == "__main__":
    # Module config: BasicConv3D(in_ch=4, out_ch=8, kernel_size=3, stride=1, padding=1)
    N, Cin, D, H, W = 2, 4, 8, 16, 16
    Cout, KSZ = 8, 3
    stride, padding, eps = 1, 1, 1e-5

    key = jax.random.PRNGKey(0)
    kx, kw, kg, kb, km, kv = jax.random.split(key, 6)

    x = jax.random.normal(kx, (N, Cin, D, H, W), jnp.float32)
    weight = jax.random.normal(kw, (Cout, Cin, KSZ, KSZ, KSZ), jnp.float32) * 0.1
    gamma = jax.random.uniform(kg, (Cout,), jnp.float32, 0.5, 1.5)
    beta = jax.random.normal(kb, (Cout,), jnp.float32) * 0.1
    running_mean = jax.random.normal(km, (Cout,), jnp.float32) * 0.1
    running_var = jax.random.uniform(kv, (Cout,), jnp.float32, 0.5, 1.5)

    out = basic_conv3d(x, weight, gamma, beta, running_mean, running_var,
                       stride=stride, padding=padding, eps=eps,
                       relu=True, bn=True)
    out = jax.block_until_ready(out)

    ref = _reference(x, weight, gamma, beta, running_mean, running_var,
                     stride=stride, padding=padding, eps=eps, relu=True, bn=True)
    assert out.shape == (N, Cout, D, H, W), out.shape
    # bf16 input/weight streams (f32 accumulation) -> looser tolerance than pure f32.
    assert jnp.allclose(out, ref, atol=5e-2, rtol=5e-2), "mismatch vs reference"

    print("KERNEL_OK")
</pallas_src>

<mosaic_0001>
module attributes {stable_mosaic.version = 11 : i64} {
  func.func @_conv_bn_relu_kernel(%arg0: i32, %arg1: memref<8x112xbf16, #tpu.memory_space<vmem>>, %arg2: memref<112x1024xbf16, #tpu.memory_space<vmem>>, %arg3: memref<8x1xf32, #tpu.memory_space<vmem>>, %arg4: memref<8x1024xf32, #tpu.memory_space<vmem>>) attributes {dimension_semantics = [#tpu.dimension_semantics<parallel>], iteration_bounds = array<i64: 4>, scalar_prefetch = 0 : i64, scratch_operands = 0 : i64, tpu.core_type = #tpu.core_type<tc>, window_params = [{pipeline_mode = #tpu.pipeline_mode<synchronous>, transform_indices = @transform_0, window_bounds = array<i64: 8, 112>}, {transform_indices = @transform_1, window_bounds = array<i64: 112, 1024>}, {pipeline_mode = #tpu.pipeline_mode<synchronous>, transform_indices = @transform_2, window_bounds = array<i64: 8, 1>}, {transform_indices = @transform_3, window_bounds = array<i64: 8, 1024>}]} {
    %c0 = arith.constant 0 : index
    %c0_0 = arith.constant 0 : index
    %0 = vector.load %arg1[%c0, %c0_0] : memref<8x112xbf16, #tpu.memory_space<vmem>>, vector<8x112xbf16>
    %c0_1 = arith.constant 0 : index
    %c0_2 = arith.constant 0 : index
    %1 = vector.load %arg2[%c0_1, %c0_2] : memref<112x1024xbf16, #tpu.memory_space<vmem>>, vector<112x1024xbf16>
    %cst = arith.constant dense<0.000000e+00> : vector<8x1024xf32>
    %2 = tpu.matmul %0, %1, %cst {dimension_numbers = #tpu.dot_dimension_numbers<[1], [0], [0], [1], [0, 0, 1, 1], [], []>} : vector<8x112xbf16>, vector<112x1024xbf16>, vector<8x1024xf32> -> vector<8x1024xf32>
    %c0_3 = arith.constant 0 : index
    %c0_4 = arith.constant 0 : index
    %3 = vector.load %arg3[%c0_3, %c0_4] : memref<8x1xf32, #tpu.memory_space<vmem>>, vector<8x1xf32>
    %4 = vector.broadcast %3 : vector<8x1xf32> to vector<8x1024xf32>
    %5 = arith.addf %2, %4 : vector<8x1024xf32>
    %cst_5 = arith.constant 0.000000e+00 : f32
    %6 = vector.broadcast %cst_5 : f32 to vector<8x1024xf32>
    %7 = arith.maximumf %5, %6 : vector<8x1024xf32>
    %c0_6 = arith.constant 0 : index
    %c0_7 = arith.constant 0 : index
    %8 = vector.load %arg4[%c0_6, %c0_7] : memref<8x1024xf32, #tpu.memory_space<vmem>>, vector<8x1024xf32>
    tpu.vector_store %arg4[%c0_6, %c0_7], %7 {strides = array<i32>} : memref<8x1024xf32, #tpu.memory_space<vmem>>, vector<8x1024xf32>,
    return
  }
  func.func @transform_0(%arg0: i32) -> (i32, i32) {
    %c0_i32 = arith.constant 0 : i32
    %c0_i32_0 = arith.constant 0 : i32
    %c0_i32_1 = arith.constant 0 : i32
    return %c0_i32, %c0_i32_0 : i32, i32
  }
  func.func @transform_1(%arg0: i32) -> (i32, i32) {
    %c0_i32 = arith.constant 0 : i32
    %c0_i32_0 = arith.constant 0 : i32
    return %c0_i32, %arg0 : i32, i32
  }
  func.func @transform_2(%arg0: i32) -> (i32, i32) {
    %c0_i32 = arith.constant 0 : i32
    %c0_i32_0 = arith.constant 0 : i32
    %c0_i32_1 = arith.constant 0 : i32
    return %c0_i32, %c0_i32_0 : i32, i32
  }
  func.func @transform_3(%arg0: i32) -> (i32, i32) {
    %c0_i32 = arith.constant 0 : i32
    %c0_i32_0 = arith.constant 0 : i32
    return %c0_i32, %arg0 : i32, i32
  }
}

</mosaic_0001>

<bundles_post_ra>
// kernel: tpu_custom_call.1
= control target key start
LH: loop header
LB: loop body
LE: loop exit
PB: predicated region body
PF: predicated region fallthrough
CT: control target
= control target key end

     0   :  { %8 = vsyncpa [#allocation3], 0  ;;  %s1289_s0 = inlined_call_operand.vmem [shape: bf16[8,112], index: 0, kind: input, shape index: {}]   ;;  %s1290_s1 = inlined_call_operand.hbm [shape: bf16[112,4096], index: 1, kind: input, shape index: {}]   ;;  %s1291_s2 = inlined_call_operand.vmem [shape: f32[8,1], index: 2, kind: input, shape index: {}]   ;;  %s1292_s3 = inlined_call_operand.hbm [shape: f32[8,4096], index: 3, kind: output, shape index: {}]  }
   0x1   :  { %10 = vsyncpa [#allocation3 + $0x1], 0 }
   0x2   :  { %11 = vsyncpa [#allocation4], 0 }
   0x3   :  { %13 = vsyncpa [#allocation4 + $0x1], 0  ;;  %s1055_s12 = smov 0   ;;  %s1057_s13 = smov 0  }
   0x4   :  { %s1059_s14 = smov 0   ;;  %s1061_s15 = smov 0  }
   0x5 LB: > { %s1076_s16 = sadd.s32 4294967295, %s1027_s15   ;;  %s804_s17 = sadd.s32 4294967294, %s1027_s15   ;;  %s1027_s15 = sphi %s1061_s15, %s1304_s15   ;;  %s1023_s14 = sphi %s1059_s14, %s1303_s14   ;;  %s1019_s13 = sphi %s1057_s13, %s1302_s13   ;;  %s1015_s12 = sphi %s1055_s12, %s1301_s12  }
   0x6   : > { %s1080_s18 = sadd.s32 1, %s1027_s15   ;;  %s47_s19 = sadd.s32 1, %s1023_s14 }
   0x7   : > { %s44_s20 = ssub.s32 %s1027_s15, %s1080_s18  ;;  %p54_p0 = scmp.ne.s32.totalorder %s1023_s14, %s1019_s13 }
   0x8   : > { %p45_p1 = scmp.eq.s32.totalorder %s44_s20, 0  ;;  %p55_p2 = scmp.eq.s32.totalorder %s1027_s15, 0 }
   0x9   : > { %p60_p3 = scmp.ne.s32.totalorder %s1019_s13, %s1015_s12  ;;  %p61_p4 = scmp.eq.s32.totalorder %s1076_s16, 0 }
   0xa   : > { %s1092_s21 = scalar_select %p45_p1, %s1023_s14, %s47_s19  }
   0xb   : > { %p56_p5 = por %p55_p2, %p54_p0  ;;  %p1094_p6 = por %p61_p4, %p60_p3 }
   0xc   : > { %p105_p7 = scmp.eq.s32.totalorder %s1076_s16, 3  ;;  %p111_p8 = scmp.eq.s32.totalorder %s804_s17, 3 }
   0xd   : > { %p892_p9 = scmp.lt.s32.totalorder %s1027_s15, 4  ;;  %s137_s25 = sand.u32 1, %s1023_s14  }
   0xe   : > { %p1100_p10 = por %p105_p7, %p54_p0  ;;  %p1104_p11 = por %p111_p8, %p60_p3 }
   0xf   : > { %s876_s26 = sshll.u32 %s1027_s15, 9  ;;  %s878_s27 = smul.u32 448, %s137_s25 }
  0x10   : > { %s1295_s23 = scalar_select %p1100_p10, 1, 0 }
  0x11   : > { %s1296_s24 = scalar_select %p1104_p11, 1, 0 }
  0x12   : > { %s1113_s30 = scalar_lea.hbm %s1290_s1, %s876_s26  ;;  %p1115_p12 = pnand %p892_p9, %p56_p5 }
  0x13   : > { %s141_s5 = scalar_lea.vmem [#allocation2], %s878_s27  ;;  %s1122_s7 = scalar_lea.sflag [#allocation3], %s137_s25 }
  0x14   : > { %s148_s6 = sshll.u32 %s141_s5, 4  ;;  %s931_s8 = scalar_lea.hbm %s1113_s30, 7168  ;;  %s1119_s6 = int_to_ptr.vmem [resolvable:$true] %s148_s6 }
  0x15   : > { %p932_p0 = scmp.ne.s32.totalorder %s1113_s30, %s931_s8  ;;  %p933_p1 = pneg %p1115_p12 }
  0x16   : > { %s936_s11 = scalar_lea.hbm %s1290_s1, 28672  ;;  %p937_p4 = scmp.lt.u32.totalorder %s1113_s30, %s1290_s1 }
  0x17   : > { %p934_p2 = pnand %p933_p1, %p932_p0  ;;  %p938_p5 = scmp.lt.u32.totalorder %s936_s11, %s931_s8 }
  0x18   : > { %p940_p8 = scmp.lt.u32.totalorder %s931_s8, %s1113_s30 }
  0x19   : > { %p935_p3 = pneg %p934_p2  ;;  %p939_p7 = por %p938_p5, %p937_p4 }
  0x1b   : > { %p941_p9 = por %p940_p8, %p939_p7 }
  0x1d   : > { %p942_p13 = pnand %p941_p9, %p935_p3 }
  0x1f   : > { %945 = shalt.err (!%p942_p13)
}
  0x20   : > { %s946_s20 = scalar_lea.vmem %s1119_s6, 7168  ;;  %s1029_s25 = smov [#allocation2]  }
  0x21   : > { %p947_p0 = scmp.ne.s32.totalorder %s1119_s6, %s946_s20  ;;  %s951_s26 = sshll.u32 %s1029_s25, 4  ;;  %s952_s26 = int_to_ptr.vmem [resolvable:$false] %s951_s26 }
  0x22   : > { %s953_s27 = scalar_lea.vmem %s952_s26, 14336  ;;  %p954_p10 = scmp.lt.s32.totalorder %s1119_s6, %s952_s26 }
  0x23   : > { %p949_p2 = pnand %p947_p0, %p933_p1  ;;  %p955_p4 = scmp.lt.s32.totalorder %s953_s27, %s946_s20 }
  0x25   : > { %p950_p11 = pneg %p949_p2  ;;  %p956_p5 = por %p955_p4, %p954_p10 }
  0x27   : > { %p957_p7 = pnand %p956_p5, %p950_p11 }
  0x29   : > { %960 = shalt.err (!%p957_p7)
}
  0x2a   : > { %s1030_s28 = smov 2048   ;;  %s1031_s29 = smov 512  }
  0x2b   : > { %s1032_s5 = smov 32   ;;  %p156_p13 = scmp.lt.s32.totalorder %s1027_s15, 5 }
  0x2c   : > { %887 = dma.hbm_to_vmem [thread:$0]  (!%p1115_p12), %s1113_s30, 7168, %s1119_s6, %s1122_s7, %s1030_s28, %s1031_s29, %s1032_s5  }
  0x2d   : > { %p1298_p1 = scmp.ge.s32.totalorder %s1027_s15, 1 }
  0x2f   : > { %p157_p3 = pnand %p1298_p1, %p156_p13 }
  0x30   : > { %s1154_s8 = sand.u32 (!%p157_p3), 1, %s1019_s13  }
  0x31   : > { %160 = sbr.rel (%p157_p3) target bundleno = 348 (0x15c), region = 32  ;;  %s163_s10 = scalar_lea.sflag (!%p157_p3), [#allocation3], %s1154_s8 }
  0x32   : > { %s879_s9 = smul.u32 (!%p157_p3), 448, %s1154_s8 }
  0x34   : > { %s1158_s11 = scalar_lea.vmem (!%p157_p3), [#allocation2], %s879_s9 }
  0x38   : > { %1006 = dma.done.wait (%p1094_p6), %s163_s10, 7168  }
  0x39   : > { %1008 = vsyncadd (%p1094_p6), %s163_s10, 4294960128  ;;  %v1033_v0 = vmov 0   ;;  %v193_v1 = vld [vmem:[%s1158_s11] sm:$0xff]  ;;  %v194_v3 = vld [vmem:[%s1158_s11 + $0x8] sm:$0xff]  ;;  %vm535_vm0 = vcmask 916480   ;;  %s810_s7 = sshll.u32 %s1154_s8, 6 }
  0x3a   : > { %571 = vmatprep.mubr.bf16.mxu0 %v1033_v0  ;;  %612 = vmatprep.mubr.bf16.mxu1 %v1033_v0  ;;  %v197_v2 = vld [vmem:[%s1158_s11 + $0x20] sm:$0xff]  ;;  %v198_v5 = vld [vmem:[%s1158_s11 + $0x28] sm:$0xff]  ;;  %v195_v56 = vld [vmem:[%s1158_s11 + $0x10] sm:$0xff]  ;;  %s188_s17 = scalar_lea.vmem [#allocation5], %s810_s7  ;;  %s877_s19 = sshll.u32 %s1076_s16, 10 }
  0x3b   : > { %930 = vset.pattern.permute.xlu0 %v1033_v0  ;;  %v812_v4 = vcombine.high %v193_v1, %v197_v2  ;;  %v811_v6 = vcombine.low %v193_v1, %v197_v2  ;;  %v201_v7 = vld [vmem:[%s1158_s11 + $0x40] sm:$0xff]  ;;  %v814_v9 = vcombine.high %v194_v3, %v198_v5  ;;  %v813_v10 = vcombine.low %v194_v3, %v198_v5  ;;  %v202_v12 = vld [vmem:[%s1158_s11 + $0x48] sm:$0xff]  ;;  %v199_v57 = vld [vmem:[%s1158_s11 + $0x30] sm:$0xff]  ;;  %s734_s20 = sshll.u32 %s188_s17, 4  ;;  %s1246_s27 = scalar_lea.hbm %s1292_s3, %s877_s19  ;;  %s1248_s20 = int_to_ptr.vmem [resolvable:$true] %s734_s20 }
  0x3c   : > { %v205_v8 = vld [vmem:[%s1158_s11 + $0x60] sm:$0xff]  ;;  %v206_v13 = vld [vmem:[%s1158_s11 + $0x68] sm:$0xff]  ;;  %v196_v58 = vld [vmem:[%s1158_s11 + $0x18] sm:$0xff]  ;;  %v816_v62 = vcombine.high %v195_v56, %v199_v57  ;;  %s720_s16 = scalar_lea.sflag [#allocation4], %s1154_s8  ;;  %s961_s28 = scalar_lea.vmem %s1248_s20, 1024 }
  0x3d   : > { %v820_v11 = vcombine.high %v201_v7, %v205_v8  ;;  %v209_v14 = vld [vmem:[%s1158_s11 + $0x80] sm:$0xff]  ;;  %539 = vmatprep.subr.bf16.mxu0 %v812_v4  ;;  %v822_v15 = vcombine.high %v202_v12, %v206_v13  ;;  %v210_v17 = vld [vmem:[%s1158_s11 + $0x88] sm:$0xff]  ;;  %580 = vmatprep.subr.bf16.mxu1 %v814_v9  ;;  %v819_v19 = vcombine.low %v201_v7, %v205_v8  ;;  %v200_v59 = vld [vmem:[%s1158_s11 + $0x38] sm:$0xff]  ;;  %p962_p6 = scmp.ne.s32.totalorder %s1248_s20, %s961_s28  ;;  %p1299_p10 = scmp.ne.s32.totalorder %s1295_s23, 0 }
  0x3e   : > { %v213_v16 = vld [vmem:[%s1158_s11 + $0xa0] sm:$0xff]  ;;  %v214_v18 = vld [vmem:[%s1158_s11 + $0xa8] sm:$0xff]  ;;  %540 = vmatpush1.bf16.msra.mxu0 %v811_v6  ;;  %581 = vmatpush1.bf16.msra.mxu1 %v813_v10  ;;  %v821_v20 = vcombine.low %v202_v12, %v206_v13  ;;  %v818_v63 = vcombine.high %v196_v58, %v200_v59  ;;  %v203_v1 = vld [vmem:[%s1158_s11 + $0x50] sm:$0xff]  ;;  %v815_v6 = vcombine.low %v195_v56, %v199_v57  ;;  %s1034_s29 = smov [#allocation5]  }
  0x3f   : > { %541 = vmatprep.subr.bf16.mxu0 %v820_v11  ;;  %v828_v21 = vcombine.high %v209_v14, %v213_v16  ;;  %582 = vmatprep.subr.bf16.mxu1 %v822_v15  ;;  %v830_v22 = vcombine.high %v210_v17, %v214_v18  ;;  %v217_v23 = vld [vmem:[%s1158_s11 + $0xc0] sm:$0xff]  ;;  %v218_v25 = vld [vmem:[%s1158_s11 + $0xc8] sm:$0xff]  ;;  %v827_v27 = vcombine.low %v209_v14, %v213_v16  ;;  %v207_v2 = vld [vmem:[%s1158_s11 + $0x70] sm:$0xff]  ;;  %p963_p11 = pnand %p962_p6, %p1299_p10  ;;  %s965_s5 = sshll.u32 %s1034_s29, 4  ;;  %s966_s5 = int_to_ptr.vmem [resolvable:$false] %s965_s5 }
  0x40   : > { %v221_v24 = vld [vmem:[%s1158_s11 + $0xe0] sm:$0xff]  ;;  %v222_v26 = vld [vmem:[%s1158_s11 + $0xe8] sm:$0xff]  ;;  %v829_v28 = vcombine.low %v210_v17, %v214_v18  ;;  %v204_v3 = vld [vmem:[%s1158_s11 + $0x58] sm:$0xff]  ;;  %v817_v7 = vcombine.low %v196_v58, %v200_v59  ;;  %v824_v8 = vcombine.high %v203_v1, %v207_v2  ;;  %v823_v14 = vcombine.low %v203_v1, %v207_v2  ;;  %s967_s9 = scalar_lea.vmem %s966_s5, 2048  ;;  %p968_p8 = scmp.lt.s32.totalorder %s1248_s20, %s966_s5 }
  0x41   : > { %v836_v29 = vcombine.high %v217_v23, %v221_v24  ;;  %v838_v30 = vcombine.high %v218_v25, %v222_v26  ;;  %v225_v31 = vld [vmem:[%s1158_s11 + $0x100] sm:$0xff]  ;;  %v226_v33 = vld [vmem:[%s1158_s11 + $0x108] sm:$0xff]  ;;  %v835_v35 = vcombine.low %v217_v23, %v221_v24  ;;  %v837_v36 = vcombine.low %v218_v25, %v222_v26  ;;  %v208_v4 = vld [vmem:[%s1158_s11 + $0x78] sm:$0xff]  ;;  %p964_p12 = pneg %p963_p11  ;;  %p969_p9 = scmp.lt.s32.totalorder %s967_s9, %s961_s28 }
  0x42   : > { %542 = vmatpush1.bf16.msra.mxu0 %v819_v19  ;;  %583 = vmatpush1.bf16.msra.mxu1 %v821_v20  ;;  %v229_v32 = vld [vmem:[%s1158_s11 + $0x120] sm:$0xff]  ;;  %v230_v34 = vld [vmem:[%s1158_s11 + $0x128] sm:$0xff]  ;;  %v826_v9 = vcombine.high %v204_v3, %v208_v4  ;;  %v211_v10 = vld [vmem:[%s1158_s11 + $0x90] sm:$0xff]  ;;  %v825_v15 = vcombine.low %v204_v3, %v208_v4 }
  0x43   : > { %543 = vmatprep.subr.bf16.mxu0 %v828_v21  ;;  %584 = vmatprep.subr.bf16.mxu1 %v830_v22  ;;  %v844_v37 = vcombine.high %v225_v31, %v229_v32  ;;  %v846_v38 = vcombine.high %v226_v33, %v230_v34  ;;  %v233_v39 = vld [vmem:[%s1158_s11 + $0x140] sm:$0xff]  ;;  %v234_v41 = vld [vmem:[%s1158_s11 + $0x148] sm:$0xff]  ;;  %v843_v43 = vcombine.low %v225_v31, %v229_v32  ;;  %v215_v11 = vld [vmem:[%s1158_s11 + $0xb0] sm:$0xff]  ;;  %p970_p0 = por %p969_p9, %p968_p8 }
  0x44   : > { %v237_v40 = vld [vmem:[%s1158_s11 + $0x160] sm:$0xff]  ;;  %v238_v42 = vld [vmem:[%s1158_s11 + $0x168] sm:$0xff]  ;;  %v845_v44 = vcombine.low %v226_v33, %v230_v34  ;;  %v212_v12 = vld [vmem:[%s1158_s11 + $0x98] sm:$0xff]  ;;  %v832_v16 = vcombine.high %v211_v10, %v215_v11  ;;  %v831_v22 = vcombine.low %v211_v10, %v215_v11 }
  0x45   : > { %v852_v45 = vcombine.high %v233_v39, %v237_v40  ;;  %v854_v46 = vcombine.high %v234_v41, %v238_v42  ;;  %v241_v47 = vld [vmem:[%s1158_s11 + $0x180] sm:$0xff]  ;;  %v242_v49 = vld [vmem:[%s1158_s11 + $0x188] sm:$0xff]  ;;  %v851_v52 = vcombine.low %v233_v39, %v237_v40  ;;  %v853_v53 = vcombine.low %v234_v41, %v238_v42  ;;  %v216_v13 = vld [vmem:[%s1158_s11 + $0xb8] sm:$0xff]  ;;  %p971_p2 = pnand %p970_p0, %p964_p12 }
  0x46   : > { %544 = vmatpush1.bf16.msra.mxu0 %v827_v27  ;;  %585 = vmatpush1.bf16.msra.mxu1 %v829_v28  ;;  %v245_v48 = vld [vmem:[%s1158_s11 + $0x1a0] sm:$0xff]  ;;  %v246_v50 = vld [vmem:[%s1158_s11 + $0x1a8] sm:$0xff]  ;;  %v834_v17 = vcombine.high %v212_v12, %v216_v13  ;;  %v219_v18 = vld [vmem:[%s1158_s11 + $0xd0] sm:$0xff]  ;;  %v833_v23 = vcombine.low %v212_v12, %v216_v13 }
  0x47   : > { %545 = vmatprep.subr.bf16.mxu0 %v836_v29  ;;  %586 = vmatprep.subr.bf16.mxu1 %v838_v30  ;;  %v249_v51 = vld [vmem:[%s1291_s2] sm:$0xff]  ;;  %v860_v54 = vcombine.high %v241_v47, %v245_v48  ;;  %v862_v55 = vcombine.high %v242_v49, %v246_v50  ;;  %v859_v60 = vcombine.low %v241_v47, %v245_v48  ;;  %v223_v19 = vld [vmem:[%s1158_s11 + $0xf0] sm:$0xff]  ;;  %v220_v20 = vld [vmem:[%s1158_s11 + $0xd8] sm:$0xff] }
  0x48   : > { %252 = vperm.xlu0 %930, %v249_v51   ;;  %v861_v61 = vcombine.low %v242_v49, %v246_v50  ;;  %v1209_v5 = vld [vmem:[%s1289_s0] sm:$0xf]  ;;  %v224_v21 = vld [vmem:[%s1158_s11 + $0xf8] sm:$0xff]  ;;  %v840_v24 = vcombine.high %v219_v18, %v223_v19  ;;  %v227_v26 = vld [vmem:[%s1158_s11 + $0x110] sm:$0xff]  ;;  %v839_v30 = vcombine.low %v219_v18, %v223_v19 }
  0x49   : > { %v842_v25 = vcombine.high %v220_v20, %v224_v21  ;;  %v231_v27 = vld [vmem:[%s1158_s11 + $0x130] sm:$0xff]  ;;  %v228_v28 = vld [vmem:[%s1158_s11 + $0x118] sm:$0xff] }
  0x4a   : > { %546 = vmatpush1.bf16.msra.mxu0 %v835_v35  ;;  %587 = vmatpush1.bf16.msra.mxu1 %v837_v36  ;;  %v232_v29 = vld [vmem:[%s1158_s11 + $0x138] sm:$0xff]  ;;  %v848_v31 = vcombine.high %v227_v26, %v231_v27  ;;  %v235_v33 = vld [vmem:[%s1158_s11 + $0x150] sm:$0xff] }
  0x4b   : > { %547 = vmatprep.subr.bf16.mxu0 %v844_v37  ;;  %588 = vmatprep.subr.bf16.mxu1 %v846_v38  ;;  %v850_v32 = vcombine.high %v228_v28, %v232_v29  ;;  %v239_v34 = vld [vmem:[%s1158_s11 + $0x170] sm:$0xff]  ;;  %v236_v35 = vld [vmem:[%s1158_s11 + $0x158] sm:$0xff]  ;;  %v847_v37 = vcombine.low %v227_v26, %v231_v27  ;;  %v849_v38 = vcombine.low %v228_v28, %v232_v29 }
  0x4c   : > { %v240_v36 = vld [vmem:[%s1158_s11 + $0x178] sm:$0xff]  ;;  %v856_v39 = vcombine.high %v235_v33, %v239_v34  ;;  %v243_v41 = vld [vmem:[%s1158_s11 + $0x190] sm:$0xff] }
  0x4d   : > { %v858_v40 = vcombine.high %v236_v35, %v240_v36  ;;  %v247_v42 = vld [vmem:[%s1158_s11 + $0x1b0] sm:$0xff] }
  0x4e   : > { %548 = vmatpush1.bf16.msra.mxu0 %v843_v43  ;;  %589 = vmatpush1.bf16.msra.mxu1 %v845_v44  ;;  %v244_v43 = vld [vmem:[%s1158_s11 + $0x198] sm:$0xff]  ;;  %v864_v47 = vcombine.high %v243_v41, %v247_v42  ;;  %v863_v49 = vcombine.low %v243_v41, %v247_v42 }
  0x4f   : > { %549 = vmatprep.subr.bf16.mxu0 %v852_v45  ;;  %590 = vmatprep.subr.bf16.mxu1 %v854_v46  ;;  %v248_v44 = vld [vmem:[%s1158_s11 + $0x1b8] sm:$0xff]  ;;  %v855_v45 = vcombine.low %v235_v33, %v239_v34  ;;  %v857_v46 = vcombine.low %v236_v35, %v240_v36 }
  0x50   : > { %v866_v48 = vcombine.high %v244_v43, %v248_v44  ;;  %v865_v50 = vcombine.low %v244_v43, %v248_v44 }
  0x52   : > { %550 = vmatpush1.bf16.msra.mxu0 %v851_v52  ;;  %591 = vmatpush1.bf16.msra.mxu1 %v853_v53 }
  0x53   : > { %551 = vmatprep.subr.bf16.mxu0 %v860_v54  ;;  %592 = vmatprep.subr.bf16.mxu1 %v862_v55 }
  0x56   : > { %552 = vmatpush1.bf16.msra.mxu0 %v859_v60  ;;  %593 = vmatpush1.bf16.msra.mxu1 %v861_v61 }
  0x57   : > { %621 = vmatprep.subr.bf16.mxu0 %v816_v62  ;;  %662 = vmatprep.subr.bf16.mxu1 %v818_v63 }
  0x59   : > { %867 = vmatmul.mubr.msk.bf16.vlgmr.msra.gmra.mrb[0].mxu0 %vm535_vm0, %v1209_v5  ;;  %868 = vmatmul.mubr.msk.bf16.vlgmr.msra.gmra.mrb[0].mxu1 %vm535_vm0, %v1209_v5 }
  0x5a   : > { %622 = vmatpush1.bf16.msra.mxu0 %v815_v6  ;;  %663 = vmatpush1.bf16.msra.mxu1 %v817_v7 }
  0x5b   : > { %623 = vmatprep.subr.bf16.mxu0 %v824_v8  ;;  %664 = vmatprep.subr.bf16.mxu1 %v826_v9 }
  0x5c   : > { %653 = vmatprep.mubr.bf16.mxu0 %v1033_v0  ;;  %694 = vmatprep.mubr.bf16.mxu1 %v1033_v0  ;;  %v841_v0 = vcombine.low %v220_v20, %v224_v21 }
  0x5e   : > { %624 = vmatpush1.bf16.msra.mxu0 %v823_v14  ;;  %665 = vmatpush1.bf16.msra.mxu1 %v825_v15 }
  0x5f   : > { %625 = vmatprep.subr.bf16.mxu0 %v832_v16  ;;  %666 = vmatprep.subr.bf16.mxu1 %v834_v17 }
  0x62   : > { %626 = vmatpush1.bf16.msra.mxu0 %v831_v22  ;;  %667 = vmatpush1.bf16.msra.mxu1 %v833_v23 }
  0x63   : > { %627 = vmatprep.subr.bf16.mxu0 %v840_v24  ;;  %668 = vmatprep.subr.bf16.mxu1 %v842_v25 }
  0x66   : > { %628 = vmatpush1.bf16.msra.mxu0 %v839_v30  ;;  %669 = vmatpush1.bf16.msra.mxu1 %v841_v0 }
  0x67   : > { %629 = vmatprep.subr.bf16.mxu0 %v848_v31  ;;  %670 = vmatprep.subr.bf16.mxu1 %v850_v32 }
  0x6a   : > { %630 = vmatpush1.bf16.msra.mxu0 %v847_v37  ;;  %671 = vmatpush1.bf16.msra.mxu1 %v849_v38 }
  0x6b   : > { %631 = vmatprep.subr.bf16.mxu0 %v856_v39  ;;  %672 = vmatprep.subr.bf16.mxu1 %v858_v40 }
  0x6e   : > { %632 = vmatpush1.bf16.msra.mxu0 %v855_v45  ;;  %673 = vmatpush1.bf16.msra.mxu1 %v857_v46 }
  0x6f   : > { %633 = vmatprep.subr.bf16.mxu0 %v864_v47  ;;  %674 = vmatprep.subr.bf16.mxu1 %v866_v48 }
  0x72   : > { %634 = vmatpush1.bf16.msra.mxu0 %v863_v49  ;;  %675 = vmatpush1.bf16.msra.mxu1 %v865_v50 }
  0x75   : > { %869 = vmatmul.mubr.msk.bf16.vlgmr.msra.gmra.mrb[4].mxu0 %vm535_vm0, %v1209_v5  ;;  %870 = vmatmul.mubr.msk.bf16.vlgmr.msra.gmra.mrb[4].mxu1 %vm535_vm0, %v1209_v5 }
  0xc7   : > { %v253_v51 = vpop.permute.xlu0 %252 }
 0x12c   : > { %v573_v52 = vpop.f32.mrb[0].mxu0  ;;  %v614_v53 = vpop.f32.mrb[0].mxu1 }
 0x12d   : > { %v574_v54 = vadd.f32 %v573_v52, %v253_v51  ;;  %v575_v55 = vpop.f32.mrb[1].mxu0  ;;  %v615_v56 = vadd.f32 %v614_v53, %v253_v51  ;;  %v616_v58 = vpop.f32.mrb[1].mxu1 }
 0x12e   : > { %v576_v57 = vadd.f32 %v575_v55, %v253_v51  ;;  %v577_v59 = vpop.f32.mrb[2].mxu0  ;;  %v617_v61 = vadd.f32 %v616_v58, %v253_v51  ;;  %v618_v62 = vpop.f32.mrb[2].mxu1 }
 0x12f   : > { %v703_v60 = vmax.f32 %v574_v54, 0.0  ;;  %v578_v63 = vpop.f32.mrb[3].mxu0  ;;  %v705_v1 = vmax.f32 %v615_v56, 0.0  ;;  %v619_v3 = vpop.f32.mrb[3].mxu1 }
 0x130   : > { %v704_v2 = vmax.f32 %v576_v57, 0.0  ;;  %v706_v4 = vmax.f32 %v617_v61, 0.0 }
 0x131   : > { %711 = vst [vmem:[%s188_s17] sm:$0xff] %v703_v60  ;;  %713 = vst [vmem:[%s188_s17 + $0x10] sm:$0xff] %v705_v1 }
 0x132   : > { %712 = vst [vmem:[%s188_s17 + $0x8] sm:$0xff] %v704_v2  ;;  %714 = vst [vmem:[%s188_s17 + $0x18] sm:$0xff] %v706_v4 }
 0x148   : > { %v655_v5 = vpop.f32.mrb[4].mxu0  ;;  %v696_v7 = vpop.f32.mrb[4].mxu1 }
 0x149   : > { %v656_v6 = vadd.f32 %v655_v5, %v253_v51  ;;  %v657_v8 = vpop.f32.mrb[5].mxu0  ;;  %v697_v9 = vadd.f32 %v696_v7, %v253_v51  ;;  %v698_v11 = vpop.f32.mrb[5].mxu1 }
 0x14a   : > { %v658_v10 = vadd.f32 %v657_v8, %v253_v51  ;;  %v659_v12 = vpop.f32.mrb[6].mxu0  ;;  %v699_v14 = vadd.f32 %v698_v11, %v253_v51  ;;  %v700_v15 = vpop.f32.mrb[6].mxu1 }
 0x14b   : > { %v707_v13 = vmax.f32 %v656_v6, 0.0  ;;  %v660_v16 = vpop.f32.mrb[7].mxu0  ;;  %v709_v17 = vmax.f32 %v697_v9, 0.0  ;;  %v701_v19 = vpop.f32.mrb[7].mxu1 }
 0x14c   : > { %v708_v18 = vmax.f32 %v658_v10, 0.0  ;;  %v710_v20 = vmax.f32 %v699_v14, 0.0 }
 0x14d   : > { %715 = vst [vmem:[%s188_s17 + $0x20] sm:$0xff] %v707_v13  ;;  %717 = vst [vmem:[%s188_s17 + $0x30] sm:$0xff] %v709_v17 }
 0x14e   : > { %716 = vst [vmem:[%s188_s17 + $0x28] sm:$0xff] %v708_v18  ;;  %718 = vst [vmem:[%s188_s17 + $0x38] sm:$0xff] %v710_v20 }
 0x14f   : > { %974 = shalt.err (!%p971_p2)
}
 0x150   : > { %s975_s8 = scalar_lea.hbm %s1246_s27, 1024  ;;  %s979_s22 = scalar_lea.hbm %s1292_s3, 4096 }
 0x151   : > { %p976_p4 = scmp.ne.s32.totalorder %s1246_s27, %s975_s8  ;;  %p980_p13 = scmp.lt.u32.totalorder %s1246_s27, %s1292_s3 }
 0x152   : > { %p981_p1 = scmp.lt.u32.totalorder %s979_s22, %s975_s8  ;;  %p983_p6 = scmp.lt.u32.totalorder %s975_s8, %s1246_s27 }
 0x153   : > { %p977_p5 = pnand %p976_p4, %p1299_p10 }
 0x154   : > { %p982_p3 = por %p981_p1, %p980_p13 }
 0x155   : > { %p978_p7 = pneg %p977_p5 }
 0x156   : > { %p984_p11 = por %p983_p6, %p982_p3 }
 0x158   : > { %p985_p12 = pnand %p984_p11, %p978_p7 }
 0x15a   : > { %988 = shalt.err (!%p985_p12)
}
 0x15b   : > { %882 = dma.vmem_to_hbm [thread:$0]  (%p1299_p10), %s1248_s20, 1024, %s1246_s27, %s720_s16  }
 0x15c PF: > { %p893_p8 = scmp.ge.s32.totalorder %s1027_s15, 2  ;;  %s746_s6 = sand.u32 1, %s1015_s12  }
 0x15d   : > { %p1300_p9 = scmp.ne.s32.totalorder %s1296_s24, 0  ;;  %s747_s7 = scalar_lea.sflag [#allocation4], %s746_s6 }
 0x15f   : > { %p889_p0 = pnand %p893_p8, %p1300_p9 }
 0x161   : > { %1010 = dma.done.wait (!%p889_p0), %s747_s7, 1024  }
 0x162   : > { %1012 = vsyncadd (!%p889_p0), %s747_s7, 4294966272  ;;  %p16_p2 = scmp.ge.s32.totalorder %s1080_s18, 6   ;;  %s1301_s12 = smov %s1019_s13 }
 0x163   : > { %s1302_s13 = smov %s1023_s14  ;;  %s1303_s14 = smov %s1092_s21 }
 0x164   : > { %s1304_s15 = smov %s1080_s18  ;;  %18 = sbr.rel (!%p16_p2) target bundleno = 5 (0x5), region = 77 }
 0x16b   :  { %752 = vsyncpa [#allocation3], 1 }
 0x16c   :  { %754 = vsyncpa [#allocation3 + $0x1], 1 }
 0x16d   :  { %755 = vsyncpa [#allocation4], 1 }
 0x16e   :  { %757 = vsyncpa [#allocation4 + $0x1], 1 }

</bundles_post_ra>
